<compile_context>
chip_gen: v5e
topology: v5e:2x2
jax: 0.10.0
libtpu: 0.0.40
codegen_flags: <defaults>
</compile_context>

<pallas_src>
import math

import jax
import jax.numpy as jnp
from jax.experimental import pallas as pl
from jax.experimental.pallas import tpu as pltpu

_MASK_VALUE = -1e30  # large finite negative; exp() underflows to exactly 0.


def _attn_head_kernel(x_ref, wqkv_ref, wo_ref, o_ref):
    d_head = wo_ref.shape[0]
    inv_scale = 1.0 / math.sqrt(d_head)

    x = x_ref[...].astype(jnp.bfloat16)          # (S, D)  MXU operand dtype
    w_qkv = wqkv_ref[...]                        # (D, 3H) already bf16
    w_o = wo_ref[...]                            # (H, D)  already bf16

    # Fused QKV projection: one MXU pass with a 3H-wide output, f32 accumulate.
    qkv = jnp.dot(x, w_qkv, preferred_element_type=jnp.float32)   # (S, 3H) f32
    q = qkv[:, :d_head] * inv_scale              # scale (S, H), not (S, S)
    k = qkv[:, d_head:2 * d_head]
    v = qkv[:, 2 * d_head:]

    # scores = q @ k^T, contracting over d_head without materializing k.T.
    scores = jax.lax.dot_general(
        q.astype(jnp.bfloat16), k.astype(jnp.bfloat16),
        dimension_numbers=(((1,), (1,)), ((), ())),
        preferred_element_type=jnp.float32)      # (S, S) f32

    # Causal mask: strictly-upper-triangular entries masked out
    # (matches torch.triu(full(-inf), diagonal=1)).
    s = scores.shape
    row = jax.lax.broadcasted_iota(jnp.int32, s, 0)
    col = jax.lax.broadcasted_iota(jnp.int32, s, 1)
    scores = jnp.where(col > row, _MASK_VALUE, scores)

    # Numerically stable softmax over the last axis, kept in f32.
    m = jnp.max(scores, axis=-1, keepdims=True)
    e = jnp.exp(scores - m)
    attn = e * pl.reciprocal(jnp.sum(e, axis=-1, keepdims=True), approx=True)

    # attn @ V @ W_o, both on the MXU with bf16 operands / f32 accumulation.
    ctx = jnp.dot(attn.astype(jnp.bfloat16), v.astype(jnp.bfloat16),
                  preferred_element_type=jnp.float32)             # (S, H)
    out = jnp.dot(ctx.astype(jnp.bfloat16), w_o,
                  preferred_element_type=jnp.float32)             # (S, D)
    o_ref[...] = out.astype(o_ref.dtype)


def attention_head(x, w_q, w_k, w_v, w_o):
    """x: (n_context, d_model) -> (n_context, d_model)."""
    n_context, d_model = x.shape
    # Build the fused QKV weight once, outside the kernel, pre-cast to bf16
    # (in a real model the stacked bf16 weight would simply be stored this way).
    w_qkv = jnp.concatenate([w_q, w_k, w_v], axis=1).astype(jnp.bfloat16)
    w_o_bf16 = w_o.astype(jnp.bfloat16)
    # TODO(synk): for realistic n_context, add a query-tile grid with an
    # online-softmax (flash-style) accumulator and batch over heads so the
    # second TensorCore (v7x) / megacore sharding can be exploited.
    return pl.pallas_call(
        _attn_head_kernel,
        out_shape=jax.ShapeDtypeStruct((n_context, d_model), x.dtype),
        in_specs=[
            pl.BlockSpec(memory_space=pltpu.VMEM),
            pl.BlockSpec(memory_space=pltpu.VMEM),
            pl.BlockSpec(memory_space=pltpu.VMEM),
        ],
        out_specs=pl.BlockSpec(memory_space=pltpu.VMEM),
    )(x, w_qkv, w_o_bf16)


def _reference(x, w_q, w_k, w_v, w_o):
    q = x @ w_q
    k = x @ w_k
    v = x @ w_v
    scores = q @ k.T / math.sqrt(w_q.shape[-1])
    s = x.shape[0]
    mask = jnp.triu(jnp.full((s, s), -jnp.inf), k=1)
    attn = jax.nn.softmax(scores + mask, axis=-1)
    return attn @ v @ w_o


if __name__ == "__main__":
    # Small shapes consistent with the module: GPTConfig(d_model=128, d_head=32), seq = 8.
    n_context, d_model, d_head = 8, 128, 32

    key = jax.random.PRNGKey(0)
    kx, kq, kk, kv, ko = jax.random.split(key, 5)

    x = jax.random.normal(kx, (n_context, d_model), dtype=jnp.float32)
    # Deterministic parameter init mirroring torch.randn(...) * scale.
    w_q = jax.random.normal(kq, (d_model, d_head), dtype=jnp.float32) * (1.0 / d_model ** 0.5)
    w_k = jax.random.normal(kk, (d_model, d_head), dtype=jnp.float32) * (1.0 / d_model ** 0.5)
    w_v = jax.random.normal(kv, (d_model, d_head), dtype=jnp.float32) * (1.0 / d_model ** 0.5)
    w_o = jax.random.normal(ko, (d_head, d_model), dtype=jnp.float32) * (1.0 / d_head ** 0.5)

    out = attention_head(x, w_q, w_k, w_v, w_o)
    out = jax.block_until_ready(out)

    ref = _reference(x, w_q, w_k, w_v, w_o)
    assert out.shape == (n_context, d_model)
    # bf16 MXU operands (f32 accumulate) loosen numerics vs the pure-f32 reference.
    assert jnp.allclose(out, ref, atol=5e-2, rtol=5e-2), "mismatch vs JAX reference"

    print("KERNEL_OK")
</pallas_src>

<mosaic_0001>
module attributes {stable_mosaic.version = 11 : i64} {
  func.func @_attn_head_kernel(%arg0: memref<8x128xf32, #tpu.memory_space<vmem>>, %arg1: memref<128x96xbf16, #tpu.memory_space<vmem>>, %arg2: memref<32x128xbf16, #tpu.memory_space<vmem>>, %arg3: memref<8x128xf32, #tpu.memory_space<vmem>>) attributes {dimension_semantics = [], scalar_prefetch = 0 : i64, scratch_operands = 0 : i64, tpu.core_type = #tpu.core_type<tc>} {
    %c0 = arith.constant 0 : index
    %c0_0 = arith.constant 0 : index
    %0 = vector.load %arg0[%c0, %c0_0] : memref<8x128xf32, #tpu.memory_space<vmem>>, vector<8x128xf32>
    %1 = arith.truncf %0 : vector<8x128xf32> to vector<8x128xbf16>
    %c0_1 = arith.constant 0 : index
    %c0_2 = arith.constant 0 : index
    %2 = vector.load %arg1[%c0_1, %c0_2] : memref<128x96xbf16, #tpu.memory_space<vmem>>, vector<128x96xbf16>
    %c0_3 = arith.constant 0 : index
    %c0_4 = arith.constant 0 : index
    %3 = vector.load %arg2[%c0_3, %c0_4] : memref<32x128xbf16, #tpu.memory_space<vmem>>, vector<32x128xbf16>
    %cst = arith.constant dense<0.000000e+00> : vector<8x96xf32>
    %4 = tpu.matmul %1, %2, %cst {dimension_numbers = #tpu.dot_dimension_numbers<[1], [0], [0], [1], [0, 0, 1, 1], [], []>} : vector<8x128xbf16>, vector<128x96xbf16>, vector<8x96xf32> -> vector<8x96xf32>
    %5 = vector.extract_strided_slice %4 {offsets = [0, 0], sizes = [8, 32], strides = [1, 1]} : vector<8x96xf32> to vector<8x32xf32>
    %cst_5 = arith.constant 0.176776692 : f32
    %6 = vector.broadcast %cst_5 : f32 to vector<8x32xf32>
    %7 = arith.mulf %5, %6 : vector<8x32xf32>
    %8 = vector.extract_strided_slice %4 {offsets = [0, 32], sizes = [8, 32], strides = [1, 1]} : vector<8x96xf32> to vector<8x32xf32>
    %9 = vector.extract_strided_slice %4 {offsets = [0, 64], sizes = [8, 32], strides = [1, 1]} : vector<8x96xf32> to vector<8x32xf32>
    %10 = arith.truncf %7 : vector<8x32xf32> to vector<8x32xbf16>
    %11 = arith.truncf %8 : vector<8x32xf32> to vector<8x32xbf16>
    %cst_6 = arith.constant dense<0.000000e+00> : vector<8x8xf32>
    %12 = tpu.matmul %10, %11, %cst_6 {dimension_numbers = #tpu.dot_dimension_numbers<[1], [1], [0], [0], [0, 0, 1, 0], [], []>} : vector<8x32xbf16>, vector<8x32xbf16>, vector<8x8xf32> -> vector<8x8xf32>
    %13 = tpu.iota {dimensions = array<i32: 0>} : vector<8x8xi32>
    %14 = tpu.iota {dimensions = array<i32: 1>} : vector<8x8xi32>
    %15 = arith.cmpi sgt, %14, %13 : vector<8x8xi32>
    %cst_7 = arith.constant -1.000000e+30 : f32
    %16 = vector.broadcast %cst_7 : f32 to vector<8x8xf32>
    %17 = arith.select %15, %16, %12 : vector<8x8xi1>, vector<8x8xf32>
    %cst_8 = arith.constant dense<0xFF800000> : vector<8xf32>
    %18 = vector.multi_reduction <maximumf>, %17, %cst_8 [1] : vector<8x8xf32> to vector<8xf32>
    %19 = vector.shape_cast %18 : vector<8xf32> to vector<8x1xf32>
    %20 = vector.broadcast %19 : vector<8x1xf32> to vector<8x8xf32>
    %21 = arith.subf %17, %20 : vector<8x8xf32>
    %22 = math.exp %21 : vector<8x8xf32>
    %cst_9 = arith.constant dense<0.000000e+00> : vector<8xf32>
    %23 = vector.multi_reduction <add>, %22, %cst_9 [1] : vector<8x8xf32> to vector<8xf32>
    %24 = vector.shape_cast %23 : vector<8xf32> to vector<8x1xf32>
    %25 = tpu.reciprocal %24 {approx = true} : vector<8x1xf32> -> vector<8x1xf32>
    %26 = vector.broadcast %25 : vector<8x1xf32> to vector<8x8xf32>
    %27 = arith.mulf %22, %26 : vector<8x8xf32>
    %28 = arith.truncf %27 : vector<8x8xf32> to vector<8x8xbf16>
    %29 = arith.truncf %9 : vector<8x32xf32> to vector<8x32xbf16>
    %cst_10 = arith.constant dense<0.000000e+00> : vector<8x32xf32>
    %30 = tpu.matmul %28, %29, %cst_10 {dimension_numbers = #tpu.dot_dimension_numbers<[1], [0], [0], [1], [0, 0, 1, 1], [], []>} : vector<8x8xbf16>, vector<8x32xbf16>, vector<8x32xf32> -> vector<8x32xf32>
    %31 = arith.truncf %30 : vector<8x32xf32> to vector<8x32xbf16>
    %cst_11 = arith.constant dense<0.000000e+00> : vector<8x128xf32>
    %32 = tpu.matmul %31, %3, %cst_11 {dimension_numbers = #tpu.dot_dimension_numbers<[1], [0], [0], [1], [0, 0, 1, 1], [], []>} : vector<8x32xbf16>, vector<32x128xbf16>, vector<8x128xf32> -> vector<8x128xf32>
    %c0_12 = arith.constant 0 : index
    %c0_13 = arith.constant 0 : index
    %33 = vector.load %arg3[%c0_12, %c0_13] : memref<8x128xf32, #tpu.memory_space<vmem>>, vector<8x128xf32>
    tpu.vector_store %arg3[%c0_12, %c0_13], %32 {strides = array<i32>} : memref<8x128xf32, #tpu.memory_space<vmem>>, vector<8x128xf32>,
    return
  }
}

</mosaic_0001>

<bundles_post_ra>
// kernel: tpu_custom_call.1
= control target key start
LH: loop header
LB: loop body
LE: loop exit
PB: predicated region body
PF: predicated region fallthrough
CT: control target
= control target key end

     0   :  { %s363_s0 = inlined_call_operand.vmem [shape: f32[8,128], index: 0, kind: input, shape index: {}]   ;;  %s364_s1 = inlined_call_operand.vmem [shape: bf16[128,96], index: 1, kind: input, shape index: {}]   ;;  %s365_s2 = inlined_call_operand.vmem [shape: bf16[32,128], index: 2, kind: input, shape index: {}]   ;;  %s366_s3 = inlined_call_operand.hbm [shape: f32[8,128], index: 3, kind: output, shape index: {}]  }
   0x1   :  { %v262_v0 = vld [vmem:[%s364_s1 + $0x38] sm:$0xff]  ;;  %v261_v1 = vld [vmem:[%s364_s1 + $0x30] sm:$0xff] }
   0x2   :  { %86 = vmatpush.bf16.msra.mxu0 %v262_v0 }
   0x3   :  { %8 = vsyncpa [#allocation3], 0  ;;  %v260_v2 = vld [vmem:[%s364_s1 + $0x28] sm:$0xff]  ;;  %v259_v3 = vld [vmem:[%s364_s1 + $0x20] sm:$0xff]  ;;  %s298_s30 = smov 96   ;;  %vm105_vm0 = vcmask 261120   ;;  %v125_v17 = vlaneseq }
   0x4   :  { %v258_v4 = vld [vmem:[%s364_s1 + $0x18] sm:$0xff]  ;;  %v257_v5 = vld [vmem:[%s364_s1 + $0x10] sm:$0xff]  ;;  %v256_v6 = vld [vmem:[%s364_s1 + $0x8] sm:$0xff]  ;;  %vm131_vm2 = vcmask 64512   ;;  %vm149_vm3 = vcmask 1043456   ;;  %s300_s7 = smov [#allocation2]  }
   0x5   :  { %v255_v7 = vld [vmem:[%s364_s1] sm:$0xff]  ;;  %v126_v18 = vshrl.u32 %v125_v17, 7  ;;  %v128_v19 = vand.u32 127, %v125_v17  ;;  %v264_v29 = vld [vmem:[%s365_s2 + $0x8] sm:$0xff]  ;;  %s201_s8 = sshll.u32 %s300_s7, 4  ;;  %s203_s11 = sshll.u32 %s366_s3, 4  ;;  %s202_s8 = int_to_ptr.vmem [resolvable:$true] %s201_s8  ;;  %s204_s11 = int_to_ptr.hbm [resolvable:$true] %s203_s11 }
   0x6   :  { %87 = vmatpush.bf16.msra.mxu0 %v261_v1  ;;  %v16_v8 = vld [vmem:[%s363_s0] sm:$0xff]  ;;  %s299_s0 = smov 64   ;;  %188 = vmatpush.bf16.msra.mxu3 %v264_v29 }
   0x7   :  { %v17_v9 = vpack.c.bf16 %v16_v8, %v16_v8  ;;  %vm129_vm1 = vcmp.gt.s32.totalorder %v128_v19, %v126_v18  ;;  %v263_v36 = vld [vmem:[%s365_s2] sm:$0xff] }
   0xa   :  { %88 = vmatpush.bf16.msra.mxu0 %v260_v2  ;;  %189 = vmatpush.bf16.msra.mxu3 %v263_v36 }
   0xe   :  { %89 = vmatpush.bf16.msra.mxu0 %v259_v3 }
  0x12   :  { %90 = vmatpush.bf16.msra.mxu0 %v258_v4 }
  0x16   :  { %91 = vmatpush.bf16.msra.mxu0 %v257_v5 }
  0x1a   :  { %92 = vmatpush.bf16.msra.mxu0 %v256_v6 }
  0x1e   :  { %93 = vmatpush.bf16.msra.mxu0 %v255_v7 }
  0x21   :  { %94 = vmatmul.bf16.vlgmr.msra.gmra.mxu0 %v17_v9 }
  0x9e   :  { %v95_v10 = vpop.f32.mrf.mxu0 }
  0x9f   :  { %v101_v11 = vpack.c.bf16 %v95_v10, %v95_v10  ;;  %v99_v15 = vmul.f32 0.17677669, %v95_v10 }
  0xa1   :  { %103 = vrot.lane.b32.xlu0 %v101_v11, %s298_s30  ;;  %v100_v16 = vpack.c.bf16 %v99_v15, %v99_v15 }
  0xa6   :  { %v97_v12 = vpop.f32.mrf.mxu0 }
 0x113   :  { %v104_v13 = vpop.permute.xlu0 %103 }
 0x114   :  { %v110_v14 = vsel %vm105_vm0, %v104_v13, 0 }
 0x115   :  { %119 = vmatpush.bf16.xpose.msra.mxu1 %v110_v14 }
 0x11c   :  { %244 = vmatmul.msk.bf16.vlgmr.msra.gmra.mxu1 %vm105_vm0, %v100_v16 }
 0x199   :  { %v121_v20 = vpop.f32.mrf.mxu1 }
 0x19a   :  { %v130_v21 = vsel %vm129_vm1, -1e+30, %v121_v20 }
 0x19b   :  { %v132_v22 = vsel %vm131_vm2, %v130_v21, -inf }
 0x19c   :  { %133 = vmax.xlane.f32.xlu0 %v132_v22 }
 0x1a1   :  { %v123_v23 = vpop.f32.mrf.mxu1 }
 0x20f   :  { %v134_v24 = vpop.xlane.xlu0 %133 }
 0x210   :  { %v135_v25 = vsub.f32 %v130_v21, %v134_v24 }
 0x212   :  { %v136_v26 = vmul.f32 1.442695, %v135_v25 }
 0x214   :  { %268 = vpow2.f32 %v136_v26 }
 0x21a   :  { %v269_v27 = vpop.eup %268 }
 0x21b   :  { %v138_v28 = vsel %vm131_vm2, %v269_v27, 0.0 }
 0x21c   :  { %139 = vadd.xlane.f32.xlu1 %v138_v28 }
 0x235   :  { %144 = vrot.lane.b32.xlu1 %v101_v11, %s299_s0 }
 0x28f   :  { %v140_v30 = vpop.xlane.xlu1 %139 }
 0x290   :  { %270 = vrcp.f32 %v140_v30 }
 0x296   :  { %v271_v31 = vpop.eup %270 }
 0x297   :  { %v142_v32 = vmul.f32 %v271_v31, %v269_v27 }
 0x299   :  { %v143_v35 = vpack.c.bf16 %v142_v32, %v142_v32 }
 0x2a7   :  { %v145_v33 = vpop.permute.xlu1 %144 }
 0x2a8   :  { %v151_v34 = vsel %vm149_vm3, %v145_v33, 0 }
 0x2a9   :  { %160 = vmatpush.bf16.msra.mxu2 %v151_v34 }
 0x2ac   :  { %245 = vmatmul.msk.bf16.vlgmr.msra.gmra.mxu2 %vm131_vm2, %v143_v35 }
 0x32f   :  { %v162_v37 = vpop.f32.mrf.mxu2 }
 0x330   :  { %v166_v38 = vpack.c.bf16 %v162_v37, %v162_v37 }
 0x332   :  { %254 = vmatmul.msk.bf16.vlgmr.msra.gmra.mxu3 %vm105_vm0, %v166_v38 }
 0x337   :  { %v164_v39 = vpop.f32.mrf.mxu2 }
 0x3b5   :  { %v191_v40 = vpop.f32.mrf.mxu3 }
 0x3b6   :  { %195 = vst [vmem:[#allocation2] sm:$0xff] %v191_v40 }
 0x3b7   :  { %206 = dma.vmem_to_hbm [thread:$0]  %s202_s8, 128, %s204_s11, [#allocation3]  }
 0x3bd   :  { %v193_v41 = vpop.f32.mrf.mxu3 }
 0x3be   :  { %296 = dma.done.wait [#allocation3], 128  }
 0x3bf   :  { %297 = vsyncadd [#allocation3], 4294967168 }
 0x3c0   :  { %211 = vsyncpa [#allocation3], 1 }

</bundles_post_ra>
